<compile_context>
chip_gen: v7x
topology: tpu7x:2x2x1
jax: 0.10.0
libtpu: 0.0.40
codegen_flags: <defaults>
</compile_context>

<pallas_src>
import functools
import math

import jax
import jax.numpy as jnp
from jax import lax
from jax.experimental import pallas as pl
from jax.experimental.pallas import tpu as pltpu

LANE = 128


def _round_up(n, m):
    return (n + m - 1) // m * m


def decoder_layer_kernel(x_ref, wq_ref, wk_ref, wv_ref,
                         w1_ref, b1_ref, w2_ref, b2_ref,
                         g1_ref, be1_ref, g2_ref, be2_ref,
                         o_ref, *, d_model, n_seq):
    eps = 1e-5
    inv_count = 1.0 / float(n_seq * d_model)        # LN stats over the REAL slab
    inv_sqrt_d = 1.0 / math.sqrt(d_model)

    x = x_ref[...]                                  # (S, Dp) f32, padded lanes == 0
    x_bf = x.astype(jnp.bfloat16)                   # MXU operands in bf16

    # ---------------- AttentionBlock (self-attention, no mask, no bias) ----
    q = jnp.dot(x_bf, wq_ref[...], preferred_element_type=jnp.float32)
    k = jnp.dot(x_bf, wk_ref[...], preferred_element_type=jnp.float32)
    v = jnp.dot(x_bf, wv_ref[...], preferred_element_type=jnp.float32)

    # Fuse the 1/sqrt(d_model) scale into q (cheaper than scaling the SxS scores).
    q = q * inv_sqrt_d

    # Contract on the last axes -> MXU does the "k^T" internally (no XLU transpose).
    scores = lax.dot_general(
        q.astype(jnp.bfloat16), k.astype(jnp.bfloat16),
        dimension_numbers=(((1,), (1,)), ((), ())),
        preferred_element_type=jnp.float32)         # (S, S)

    m = jnp.max(scores, axis=-1, keepdims=True)
    p = jnp.exp(scores - m)
    denom = jnp.sum(p, axis=-1, keepdims=True)
    p = p * pl.reciprocal(denom, approx=True)       # divide on the EUP slot

    attn = jnp.dot(p.astype(jnp.bfloat16), v.astype(jnp.bfloat16),
                   preferred_element_type=jnp.float32)

    # ---------------- ResidualConnection 1 (dropout = identity) ------------
    # LayerNorm(normalized_shape=[n_seq, d_model]): normalize over the whole
    # (S, D) slab.  Padded lanes are zero, so sums over the padded slab equal
    # sums over the real slab; divide by the real count.  One-pass stats.
    h1 = x + attn
    mu1 = jnp.sum(h1) * inv_count
    ex2_1 = jnp.sum(h1 * h1) * inv_count
    var1 = ex2_1 - mu1 * mu1
    y1 = g1_ref[...] * ((h1 - mu1) * lax.rsqrt(var1 + eps)) + be1_ref[...]

    # ---------------- FeedForwardBlock (Linear -> Linear, dropout = id) ----
    hdn = jnp.dot(y1.astype(jnp.bfloat16), w1_ref[...],
                  preferred_element_type=jnp.float32) + b1_ref[...]
    f = jnp.dot(hdn.astype(jnp.bfloat16), w2_ref[...],
                preferred_element_type=jnp.float32) + b2_ref[...]

    # ---------------- ResidualConnection 2 ---------------------------------
    h2 = y1 + f
    mu2 = jnp.sum(h2) * inv_count
    ex2_2 = jnp.sum(h2 * h2) * inv_count
    var2 = ex2_2 - mu2 * mu2
    y2 = g2_ref[...] * ((h2 - mu2) * lax.rsqrt(var2 + eps)) + be2_ref[...]

    o_ref[...] = y2.astype(o_ref.dtype)


def decoder_layer(x, params):
    B, S, D = x.shape
    d_ff = params["w1_t"].shape[1]
    Dp = _round_up(D, LANE)
    Fp = _round_up(d_ff, LANE)

    f32, bf16 = jnp.float32, jnp.bfloat16

    def pad2(a, rows, cols, dtype):
        a = a.astype(f32)
        a = jnp.pad(a, ((0, rows - a.shape[0]), (0, cols - a.shape[1])))
        return a.astype(dtype)

    xp = jnp.pad(x.astype(f32), ((0, 0), (0, 0), (0, Dp - D)))

    wq = pad2(params["wq_t"], Dp, Dp, bf16)
    wk = pad2(params["wk_t"], Dp, Dp, bf16)
    wv = pad2(params["wv_t"], Dp, Dp, bf16)
    w1 = pad2(params["w1_t"], Dp, Fp, bf16)
    b1 = pad2(params["b1"], 1, Fp, f32)
    w2 = pad2(params["w2_t"], Fp, Dp, bf16)
    b2 = pad2(params["b2"], 1, Dp, f32)
    g1 = pad2(params["ln1_g"], S, Dp, f32)
    be1 = pad2(params["ln1_b"], S, Dp, f32)
    g2 = pad2(params["ln2_g"], S, Dp, f32)
    be2 = pad2(params["ln2_b"], S, Dp, f32)

    # Constant operands: whole array resident in VMEM (fetched once, not part of
    # the per-grid-step double-buffered pipeline).
    const_spec = pl.BlockSpec(memory_space=pltpu.MemorySpace.VMEM)

    kernel = functools.partial(decoder_layer_kernel, d_model=D, n_seq=S)

    out_p = pl.pallas_call(
        kernel,
        out_shape=jax.ShapeDtypeStruct((B, S, Dp), f32),
        grid=(B,),
        in_specs=[pl.BlockSpec((None, S, Dp), lambda b: (b, 0, 0))]   # x: one batch slab
                 + [const_spec] * 11,
        out_specs=pl.BlockSpec((None, S, Dp), lambda b: (b, 0, 0)),
        compiler_params=pltpu.CompilerParams(
            dimension_semantics=("parallel",),          # shard batch across TCs (v7x)
            vmem_limit_bytes=48 * 1024 * 1024,
        ),
    )(xp, wq, wk, wv, w1, b1, w2, b2, g1, be1, g2, be2)

    return out_p[:, :, :D]


def reference(x, params):
    """Pure-JAX f32 reference of the PyTorch forward (eval mode)."""
    D = x.shape[-1]
    eps = 1e-5
    q = x @ params["wq_t"]
    k = x @ params["wk_t"]
    v = x @ params["wv_t"]
    s = jnp.einsum("bqd,bkd->bqk", q, k) / math.sqrt(D)
    p = jax.nn.softmax(s, axis=-1)
    attn = jnp.einsum("bqk,bkd->bqd", p, v)

    def ln(h, g, b):
        mu = jnp.mean(h, axis=(-2, -1), keepdims=True)
        var = jnp.mean((h - mu) ** 2, axis=(-2, -1), keepdims=True)
        return g * (h - mu) / jnp.sqrt(var + eps) + b

    y1 = ln(x + attn, params["ln1_g"], params["ln1_b"])
    f = y1 @ params["w1_t"] + params["b1"]
    f = f @ params["w2_t"] + params["b2"]
    y2 = ln(y1 + f, params["ln2_g"], params["ln2_b"])
    return y2


def make_params(key, d_model, n_seq):
    d_ff = 2 * d_model
    ks = jax.random.split(key, 8)
    scale = 0.05
    return {
        "wq_t": scale * jax.random.normal(ks[0], (d_model, d_model), jnp.float32),
        "wk_t": scale * jax.random.normal(ks[1], (d_model, d_model), jnp.float32),
        "wv_t": scale * jax.random.normal(ks[2], (d_model, d_model), jnp.float32),
        "w1_t": scale * jax.random.normal(ks[3], (d_model, d_ff), jnp.float32),
        "b1": scale * jax.random.normal(ks[4], (1, d_ff), jnp.float32),
        "w2_t": scale * jax.random.normal(ks[5], (d_ff, d_model), jnp.float32),
        "b2": scale * jax.random.normal(ks[6], (1, d_model), jnp.float32),
        "ln1_g": jnp.ones((n_seq, d_model), jnp.float32),
        "ln1_b": jnp.zeros((n_seq, d_model), jnp.float32),
        "ln2_g": jnp.ones((n_seq, d_model), jnp.float32),
        "ln2_b": jnp.zeros((n_seq, d_model), jnp.float32),
    }


if __name__ == "__main__":
    B, S, D = 2, 8, 32           # batch, n_seq, d_model
    key = jax.random.PRNGKey(0)
    k_x, k_p = jax.random.split(key)
    x = jax.random.normal(k_x, (B, S, D), jnp.float32)
    params = make_params(k_p, D, S)

    out = decoder_layer(x, params)
    out = jax.block_until_ready(out)

    ref = reference(x, params)
    assert out.shape == (B, S, D)
    # Tolerance loosened vs. the pure-f32 reference because MXU operands are fed
    # in bf16 (f32 accumulation) and the softmax uses the approx EUP reciprocal.
    assert jnp.allclose(out, ref, atol=2e-2, rtol=2e-2), "mismatch vs reference"
    print("KERNEL_OK")
</pallas_src>

<mosaic_0001>
module attributes {stable_mosaic.version = 11 : i64} {
  func.func @decoder_layer_kernel(%arg0: i32, %arg1: memref<1x8x128xf32, #tpu.memory_space<vmem>>, %arg2: memref<128x128xbf16, #tpu.memory_space<vmem>>, %arg3: memref<128x128xbf16, #tpu.memory_space<vmem>>, %arg4: memref<128x128xbf16, #tpu.memory_space<vmem>>, %arg5: memref<128x128xbf16, #tpu.memory_space<vmem>>, %arg6: memref<1x128xf32, #tpu.memory_space<vmem>>, %arg7: memref<128x128xbf16, #tpu.memory_space<vmem>>, %arg8: memref<1x128xf32, #tpu.memory_space<vmem>>, %arg9: memref<8x128xf32, #tpu.memory_space<vmem>>, %arg10: memref<8x128xf32, #tpu.memory_space<vmem>>, %arg11: memref<8x128xf32, #tpu.memory_space<vmem>>, %arg12: memref<8x128xf32, #tpu.memory_space<vmem>>, %arg13: memref<1x8x128xf32, #tpu.memory_space<vmem>>) attributes {dimension_semantics = [#tpu.dimension_semantics<parallel>], iteration_bounds = array<i64: 2>, scalar_prefetch = 0 : i64, scratch_operands = 0 : i64, tpu.core_type = #tpu.core_type<tc>, window_params = [{transform_indices = @transform_0, window_bounds = array<i64: 1, 8, 128>}, {pipeline_mode = #tpu.pipeline_mode<synchronous>, transform_indices = @transform_1, window_bounds = array<i64: 128, 128>}, {pipeline_mode = #tpu.pipeline_mode<synchronous>, transform_indices = @transform_2, window_bounds = array<i64: 128, 128>}, {pipeline_mode = #tpu.pipeline_mode<synchronous>, transform_indices = @transform_3, window_bounds = array<i64: 128, 128>}, {pipeline_mode = #tpu.pipeline_mode<synchronous>, transform_indices = @transform_4, window_bounds = array<i64: 128, 128>}, {pipeline_mode = #tpu.pipeline_mode<synchronous>, transform_indices = @transform_5, window_bounds = array<i64: 1, 128>}, {pipeline_mode = #tpu.pipeline_mode<synchronous>, transform_indices = @transform_6, window_bounds = array<i64: 128, 128>}, {pipeline_mode = #tpu.pipeline_mode<synchronous>, transform_indices = @transform_7, window_bounds = array<i64: 1, 128>}, {pipeline_mode = #tpu.pipeline_mode<synchronous>, transform_indices = @transform_8, window_bounds = array<i64: 8, 128>}, {pipeline_mode = #tpu.pipeline_mode<synchronous>, transform_indices = @transform_9, window_bounds = array<i64: 8, 128>}, {pipeline_mode = #tpu.pipeline_mode<synchronous>, transform_indices = @transform_10, window_bounds = array<i64: 8, 128>}, {pipeline_mode = #tpu.pipeline_mode<synchronous>, transform_indices = @transform_11, window_bounds = array<i64: 8, 128>}, {transform_indices = @transform_12, window_bounds = array<i64: 1, 8, 128>}]} {
    %c0 = arith.constant 0 : index
    %c0_0 = arith.constant 0 : index
    %c0_1 = arith.constant 0 : index
    %0 = vector.load %arg1[%c0, %c0_0, %c0_1] : memref<1x8x128xf32, #tpu.memory_space<vmem>>, vector<1x8x128xf32>
    %1 = vector.shape_cast %0 : vector<1x8x128xf32> to vector<8x128xf32>
    %2 = arith.truncf %1 : vector<8x128xf32> to vector<8x128xbf16>
    %c0_2 = arith.constant 0 : index
    %c0_3 = arith.constant 0 : index
    %3 = vector.load %arg2[%c0_2, %c0_3] : memref<128x128xbf16, #tpu.memory_space<vmem>>, vector<128x128xbf16>
    %cst = arith.constant dense<0.000000e+00> : vector<8x128xf32>
    %4 = tpu.matmul %2, %3, %cst {dimension_numbers = #tpu.dot_dimension_numbers<[1], [0], [0], [1], [0, 0, 1, 1], [], []>} : vector<8x128xbf16>, vector<128x128xbf16>, vector<8x128xf32> -> vector<8x128xf32>
    %c0_4 = arith.constant 0 : index
    %c0_5 = arith.constant 0 : index
    %5 = vector.load %arg3[%c0_4, %c0_5] : memref<128x128xbf16, #tpu.memory_space<vmem>>, vector<128x128xbf16>
    %cst_6 = arith.constant dense<0.000000e+00> : vector<8x128xf32>
    %6 = tpu.matmul %2, %5, %cst_6 {dimension_numbers = #tpu.dot_dimension_numbers<[1], [0], [0], [1], [0, 0, 1, 1], [], []>} : vector<8x128xbf16>, vector<128x128xbf16>, vector<8x128xf32> -> vector<8x128xf32>
    %c0_7 = arith.constant 0 : index
    %c0_8 = arith.constant 0 : index
    %7 = vector.load %arg4[%c0_7, %c0_8] : memref<128x128xbf16, #tpu.memory_space<vmem>>, vector<128x128xbf16>
    %cst_9 = arith.constant dense<0.000000e+00> : vector<8x128xf32>
    %8 = tpu.matmul %2, %7, %cst_9 {dimension_numbers = #tpu.dot_dimension_numbers<[1], [0], [0], [1], [0, 0, 1, 1], [], []>} : vector<8x128xbf16>, vector<128x128xbf16>, vector<8x128xf32> -> vector<8x128xf32>
    %cst_10 = arith.constant 0.176776692 : f32
    %9 = vector.broadcast %cst_10 : f32 to vector<8x128xf32>
    %10 = arith.mulf %4, %9 : vector<8x128xf32>
    %11 = arith.truncf %10 : vector<8x128xf32> to vector<8x128xbf16>
    %12 = arith.truncf %6 : vector<8x128xf32> to vector<8x128xbf16>
    %cst_11 = arith.constant dense<0.000000e+00> : vector<8x8xf32>
    %13 = tpu.matmul %11, %12, %cst_11 {dimension_numbers = #tpu.dot_dimension_numbers<[1], [1], [0], [0], [0, 0, 1, 0], [], []>} : vector<8x128xbf16>, vector<8x128xbf16>, vector<8x8xf32> -> vector<8x8xf32>
    %cst_12 = arith.constant dense<0xFF800000> : vector<8xf32>
    %14 = vector.multi_reduction <maximumf>, %13, %cst_12 [1] : vector<8x8xf32> to vector<8xf32>
    %15 = vector.shape_cast %14 : vector<8xf32> to vector<8x1xf32>
    %16 = vector.broadcast %15 : vector<8x1xf32> to vector<8x8xf32>
    %17 = arith.subf %13, %16 : vector<8x8xf32>
    %18 = math.exp %17 : vector<8x8xf32>
    %cst_13 = arith.constant dense<0.000000e+00> : vector<8xf32>
    %19 = vector.multi_reduction <add>, %18, %cst_13 [1] : vector<8x8xf32> to vector<8xf32>
    %20 = vector.shape_cast %19 : vector<8xf32> to vector<8x1xf32>
    %21 = tpu.reciprocal %20 {approx = true} : vector<8x1xf32> -> vector<8x1xf32>
    %22 = vector.broadcast %21 : vector<8x1xf32> to vector<8x8xf32>
    %23 = arith.mulf %18, %22 : vector<8x8xf32>
    %24 = arith.truncf %23 : vector<8x8xf32> to vector<8x8xbf16>
    %25 = arith.truncf %8 : vector<8x128xf32> to vector<8x128xbf16>
    %cst_14 = arith.constant dense<0.000000e+00> : vector<8x128xf32>
    %26 = tpu.matmul %24, %25, %cst_14 {dimension_numbers = #tpu.dot_dimension_numbers<[1], [0], [0], [1], [0, 0, 1, 1], [], []>} : vector<8x8xbf16>, vector<8x128xbf16>, vector<8x128xf32> -> vector<8x128xf32>
    %27 = arith.addf %1, %26 : vector<8x128xf32>
    %28 = vector.shape_cast %27 : vector<8x128xf32> to vector<1x8x128xf32>
    %cst_15 = arith.constant dense<0.000000e+00> : vector<1xf32>
    %29 = vector.multi_reduction <add>, %28, %cst_15 [1, 2] : vector<1x8x128xf32> to vector<1xf32>
    %30 = vector.shape_cast %29 : vector<1xf32> to vector<1x1x1xf32>
    %31 = vector.extract %30[0, 0, 0] : f32 from vector<1x1x1xf32>
    %cst_16 = arith.constant 3.906250e-03 : f32
    %32 = arith.mulf %31, %cst_16 : f32
    %33 = arith.mulf %27, %27 : vector<8x128xf32>
    %34 = vector.shape_cast %33 : vector<8x128xf32> to vector<1x8x128xf32>
    %cst_17 = arith.constant dense<0.000000e+00> : vector<1xf32>
    %35 = vector.multi_reduction <add>, %34, %cst_17 [1, 2] : vector<1x8x128xf32> to vector<1xf32>
    %36 = vector.shape_cast %35 : vector<1xf32> to vector<1x1x1xf32>
    %37 = vector.extract %36[0, 0, 0] : f32 from vector<1x1x1xf32>
    %cst_18 = arith.constant 3.906250e-03 : f32
    %38 = arith.mulf %37, %cst_18 : f32
    %39 = arith.mulf %32, %32 : f32
    %40 = arith.subf %38, %39 : f32
    %c0_19 = arith.constant 0 : index
    %c0_20 = arith.constant 0 : index
    %41 = vector.load %arg9[%c0_19, %c0_20] : memref<8x128xf32, #tpu.memory_space<vmem>>, vector<8x128xf32>
    %42 = vector.broadcast %32 : f32 to vector<8x128xf32>
    %43 = arith.subf %27, %42 : vector<8x128xf32>
    %cst_21 = arith.constant 9.99999974E-6 : f32
    %44 = arith.addf %40, %cst_21 : f32
    %45 = math.rsqrt %44 : f32
    %46 = vector.broadcast %45 : f32 to vector<8x128xf32>
    %47 = arith.mulf %43, %46 : vector<8x128xf32>
    %48 = arith.mulf %41, %47 : vector<8x128xf32>
    %c0_22 = arith.constant 0 : index
    %c0_23 = arith.constant 0 : index
    %49 = vector.load %arg10[%c0_22, %c0_23] : memref<8x128xf32, #tpu.memory_space<vmem>>, vector<8x128xf32>
    %50 = arith.addf %48, %49 : vector<8x128xf32>
    %51 = arith.truncf %50 : vector<8x128xf32> to vector<8x128xbf16>
    %c0_24 = arith.constant 0 : index
    %c0_25 = arith.constant 0 : index
    %52 = vector.load %arg5[%c0_24, %c0_25] : memref<128x128xbf16, #tpu.memory_space<vmem>>, vector<128x128xbf16>
    %cst_26 = arith.constant dense<0.000000e+00> : vector<8x128xf32>
    %53 = tpu.matmul %51, %52, %cst_26 {dimension_numbers = #tpu.dot_dimension_numbers<[1], [0], [0], [1], [0, 0, 1, 1], [], []>} : vector<8x128xbf16>, vector<128x128xbf16>, vector<8x128xf32> -> vector<8x128xf32>
    %c0_27 = arith.constant 0 : index
    %c0_28 = arith.constant 0 : index
    %54 = vector.load %arg6[%c0_27, %c0_28] : memref<1x128xf32, #tpu.memory_space<vmem>>, vector<1x128xf32>
    %55 = vector.broadcast %54 : vector<1x128xf32> to vector<8x128xf32>
    %56 = arith.addf %53, %55 : vector<8x128xf32>
    %57 = arith.truncf %56 : vector<8x128xf32> to vector<8x128xbf16>
    %c0_29 = arith.constant 0 : index
    %c0_30 = arith.constant 0 : index
    %58 = vector.load %arg7[%c0_29, %c0_30] : memref<128x128xbf16, #tpu.memory_space<vmem>>, vector<128x128xbf16>
    %cst_31 = arith.constant dense<0.000000e+00> : vector<8x128xf32>
    %59 = tpu.matmul %57, %58, %cst_31 {dimension_numbers = #tpu.dot_dimension_numbers<[1], [0], [0], [1], [0, 0, 1, 1], [], []>} : vector<8x128xbf16>, vector<128x128xbf16>, vector<8x128xf32> -> vector<8x128xf32>
    %c0_32 = arith.constant 0 : index
    %c0_33 = arith.constant 0 : index
    %60 = vector.load %arg8[%c0_32, %c0_33] : memref<1x128xf32, #tpu.memory_space<vmem>>, vector<1x128xf32>
    %61 = vector.broadcast %60 : vector<1x128xf32> to vector<8x128xf32>
    %62 = arith.addf %59, %61 : vector<8x128xf32>
    %63 = arith.addf %50, %62 : vector<8x128xf32>
    %64 = vector.shape_cast %63 : vector<8x128xf32> to vector<1x8x128xf32>
    %cst_34 = arith.constant dense<0.000000e+00> : vector<1xf32>
    %65 = vector.multi_reduction <add>, %64, %cst_34 [1, 2] : vector<1x8x128xf32> to vector<1xf32>
    %66 = vector.shape_cast %65 : vector<1xf32> to vector<1x1x1xf32>
    %67 = vector.extract %66[0, 0, 0] : f32 from vector<1x1x1xf32>
    %cst_35 = arith.constant 3.906250e-03 : f32
    %68 = arith.mulf %67, %cst_35 : f32
    %69 = arith.mulf %63, %63 : vector<8x128xf32>
    %70 = vector.shape_cast %69 : vector<8x128xf32> to vector<1x8x128xf32>
    %cst_36 = arith.constant dense<0.000000e+00> : vector<1xf32>
    %71 = vector.multi_reduction <add>, %70, %cst_36 [1, 2] : vector<1x8x128xf32> to vector<1xf32>
    %72 = vector.shape_cast %71 : vector<1xf32> to vector<1x1x1xf32>
    %73 = vector.extract %72[0, 0, 0] : f32 from vector<1x1x1xf32>
    %cst_37 = arith.constant 3.906250e-03 : f32
    %74 = arith.mulf %73, %cst_37 : f32
    %75 = arith.mulf %68, %68 : f32
    %76 = arith.subf %74, %75 : f32
    %c0_38 = arith.constant 0 : index
    %c0_39 = arith.constant 0 : index
    %77 = vector.load %arg11[%c0_38, %c0_39] : memref<8x128xf32, #tpu.memory_space<vmem>>, vector<8x128xf32>
    %78 = vector.broadcast %68 : f32 to vector<8x128xf32>
    %79 = arith.subf %63, %78 : vector<8x128xf32>
    %cst_40 = arith.constant 9.99999974E-6 : f32
    %80 = arith.addf %76, %cst_40 : f32
    %81 = math.rsqrt %80 : f32
    %82 = vector.broadcast %81 : f32 to vector<8x128xf32>
    %83 = arith.mulf %79, %82 : vector<8x128xf32>
    %84 = arith.mulf %77, %83 : vector<8x128xf32>
    %c0_41 = arith.constant 0 : index
    %c0_42 = arith.constant 0 : index
    %85 = vector.load %arg12[%c0_41, %c0_42] : memref<8x128xf32, #tpu.memory_space<vmem>>, vector<8x128xf32>
    %86 = arith.addf %84, %85 : vector<8x128xf32>
    %c0_43 = arith.constant 0 : index
    %c0_44 = arith.constant 0 : index
    %c0_45 = arith.constant 0 : index
    %87 = vector.load %arg13[%c0_43, %c0_44, %c0_45] : memref<1x8x128xf32, #tpu.memory_space<vmem>>, vector<1x8x128xf32>
    %88 = vector.shape_cast %87 : vector<1x8x128xf32> to vector<8x128xf32>
    %89 = vector.shape_cast %86 : vector<8x128xf32> to vector<1x8x128xf32>
    tpu.vector_store %arg13[%c0_43, %c0_44, %c0_45], %89 {strides = array<i32>} : memref<1x8x128xf32, #tpu.memory_space<vmem>>, vector<1x8x128xf32>,
    return
  }
  func.func @transform_0(%arg0: i32) -> (i32, i32, i32) {
    %c0_i32 = arith.constant 0 : i32
    %c0_i32_0 = arith.constant 0 : i32
    %c0_i32_1 = arith.constant 0 : i32
    return %arg0, %c0_i32, %c0_i32_0 : i32, i32, i32
  }
  func.func @transform_1(%arg0: i32) -> (i32, i32) {
    %c0_i32 = arith.constant 0 : i32
    %c0_i32_0 = arith.constant 0 : i32
    %c0_i32_1 = arith.constant 0 : i32
    return %c0_i32, %c0_i32_0 : i32, i32
  }
  func.func @transform_2(%arg0: i32) -> (i32, i32) {
    %c0_i32 = arith.constant 0 : i32
    %c0_i32_0 = arith.constant 0 : i32
    %c0_i32_1 = arith.constant 0 : i32
    return %c0_i32, %c0_i32_0 : i32, i32
  }
  func.func @transform_3(%arg0: i32) -> (i32, i32) {
    %c0_i32 = arith.constant 0 : i32
    %c0_i32_0 = arith.constant 0 : i32
    %c0_i32_1 = arith.constant 0 : i32
    return %c0_i32, %c0_i32_0 : i32, i32
  }
  func.func @transform_4(%arg0: i32) -> (i32, i32) {
    %c0_i32 = arith.constant 0 : i32
    %c0_i32_0 = arith.constant 0 : i32
    %c0_i32_1 = arith.constant 0 : i32
    return %c0_i32, %c0_i32_0 : i32, i32
  }
  func.func @transform_5(%arg0: i32) -> (i32, i32) {
    %c0_i32 = arith.constant 0 : i32
    %c0_i32_0 = arith.constant 0 : i32
    %c0_i32_1 = arith.constant 0 : i32
    return %c0_i32, %c0_i32_0 : i32, i32
  }
  func.func @transform_6(%arg0: i32) -> (i32, i32) {
    %c0_i32 = arith.constant 0 : i32
    %c0_i32_0 = arith.constant 0 : i32
    %c0_i32_1 = arith.constant 0 : i32
    return %c0_i32, %c0_i32_0 : i32, i32
  }
  func.func @transform_7(%arg0: i32) -> (i32, i32) {
    %c0_i32 = arith.constant 0 : i32
    %c0_i32_0 = arith.constant 0 : i32
    %c0_i32_1 = arith.constant 0 : i32
    return %c0_i32, %c0_i32_0 : i32, i32
  }
  func.func @transform_8(%arg0: i32) -> (i32, i32) {
    %c0_i32 = arith.constant 0 : i32
    %c0_i32_0 = arith.constant 0 : i32
    %c0_i32_1 = arith.constant 0 : i32
    return %c0_i32, %c0_i32_0 : i32, i32
  }
  func.func @transform_9(%arg0: i32) -> (i32, i32) {
    %c0_i32 = arith.constant 0 : i32
    %c0_i32_0 = arith.constant 0 : i32
    %c0_i32_1 = arith.constant 0 : i32
    return %c0_i32, %c0_i32_0 : i32, i32
  }
  func.func @transform_10(%arg0: i32) -> (i32, i32) {
    %c0_i32 = arith.constant 0 : i32
    %c0_i32_0 = arith.constant 0 : i32
    %c0_i32_1 = arith.constant 0 : i32
    return %c0_i32, %c0_i32_0 : i32, i32
  }
  func.func @transform_11(%arg0: i32) -> (i32, i32) {
    %c0_i32 = arith.constant 0 : i32
    %c0_i32_0 = arith.constant 0 : i32
    %c0_i32_1 = arith.constant 0 : i32
    return %c0_i32, %c0_i32_0 : i32, i32
  }
  func.func @transform_12(%arg0: i32) -> (i32, i32, i32) {
    %c0_i32 = arith.constant 0 : i32
    %c0_i32_0 = arith.constant 0 : i32
    %c0_i32_1 = arith.constant 0 : i32
    return %arg0, %c0_i32, %c0_i32_0 : i32, i32, i32
  }
}

</mosaic_0001>

<bundles_post_ra>
// kernel: tpu_custom_call.1
= control target key start
LH: loop header
LB: loop body
LE: loop exit
PB: predicated region body
PF: predicated region fallthrough
CT: control target
= control target key end

     0   :  { %s2469_s0 = inlined_call_operand.hbm [shape: f32[2,8,128], index: 0, kind: input, shape index: {}]   ;;  %s2470_s1 = inlined_call_operand.hbm [shape: bf16[128,128], index: 1, kind: input, shape index: {}]   ;;  %s2471_s2 = inlined_call_operand.hbm [shape: bf16[128,128], index: 2, kind: input, shape index: {}]   ;;  %s2472_s3 = inlined_call_operand.hbm [shape: bf16[128,128], index: 3, kind: input, shape index: {}]   ;;  %s2473_s4 = inlined_call_operand.hbm [shape: bf16[128,128], index: 4, kind: input, shape index: {}]   ;;  %s2474_s5 = inlined_call_operand.vmem [shape: f32[1,128], index: 5, kind: input, shape index: {}]   ;;  %s2475_s6 = inlined_call_operand.hbm [shape: bf16[128,128], index: 6, kind: input, shape index: {}]   ;;  %s2476_s7 = inlined_call_operand.vmem [shape: f32[1,128], index: 7, kind: input, shape index: {}]   ;;  %s2477_s8 = inlined_call_operand.vmem [shape: f32[8,128], index: 8, kind: input, shape index: {}]   ;;  %s2478_s9 = inlined_call_operand.vmem [shape: f32[8,128], index: 9, kind: input, shape index: {}]   ;;  %s2479_s10 = inlined_call_operand.vmem [shape: f32[8,128], index: 10, kind: input, shape index: {}]   ;;  %s2480_s11 = inlined_call_operand.vmem [shape: f32[8,128], index: 11, kind: input, shape index: {}]   ;;  %s2481_s12 = inlined_call_operand.hbm [shape: f32[2,8,128], index: 12, kind: output, shape index: {}]  }
   0x1   :  { %2486 = sst [smem:[#allocation19_spill]] %s2469_s0 }
   0x2   :  { %2487 = sst [smem:[#allocation20_spill]] %s2470_s1 }
   0x3   :  { %2488 = sst [smem:[#allocation21_spill]] %s2471_s2 }
   0x4   :  { %2489 = sst [smem:[#allocation22_spill]] %s2476_s7 }
   0x5   :  { %2490 = sst [smem:[#allocation23_spill]] %s2479_s10 }
   0x6   :  { %2491 = sst [smem:[#allocation24_spill]] %s2480_s11 }
   0x7   :  { %2492 = sst [smem:[#allocation25_spill]] %s2481_s12 }
   0x8   :  { %17 = vsyncpa [#allocation3], 0 }
   0x9   :  { %19 = vsyncpa [#allocation3 + $0x1], 0 }
   0xa   :  { %20 = vsyncpa [#allocation6], 0 }
   0xb   :  { %21 = vsyncpa [#allocation9], 0 }
   0xc   :  { %22 = vsyncpa [#allocation12], 0 }
   0xd   :  { %23 = vsyncpa [#allocation4], 0 }
   0xe   :  { %25 = vsyncpa [#allocation4 + $0x1], 0  ;;  %s2063_s21 = smov 0   ;;  %s2065_s22 = smov 0  }
   0xf   :  { %s2067_s23 = smov 0   ;;  %s2069_s24 = smov 0  }
  0x10 LB: > { %s1987_s25 = smov [#allocation5]   ;;  %s2084_s27 = sadd.s32 4294967295, %s1985_s24   ;;  %s1985_s24 = sphi %s2069_s24, %s2521_s24   ;;  %s1981_s23 = sphi %s2067_s23, %s2520_s23   ;;  %s1977_s22 = sphi %s2065_s22, %s2519_s22   ;;  %s1973_s21 = sphi %s2063_s21, %s2518_s21  }
  0x11   : > { %s331_s26 = sshll.u32 %s1987_s25, 4  ;;  %p1351_p0 = scmp.ge.s32.totalorder %s1985_s24, 1  ;;  %s2089_s26 = int_to_ptr.vmem [resolvable:$true] %s331_s26 }
  0x12   : > { %p2483_p1 = scmp.eq.s32.totalorder %s2084_s27, 0  ;;  %p319_p2 = scmp.lt.s32.totalorder %s1985_s24, 3 }
  0x13   : > { %s1988_s29 = smov [#allocation8]   ;;  %s1989_s14 = smov [#allocation7]  }
  0x14   : > { %p2091_p3 = pnand %p1351_p0, %p319_p2  ;;  %s357_s30 = sshll.u32 %s1988_s29, 4  ;;  %s2104_s30 = int_to_ptr.vmem [resolvable:$true] %s357_s30 }
  0x15   : > { %s344_s15 = sshll.u32 %s1989_s14, 4  ;;  %s2495_s1 = sld [smem:[#allocation20_spill]]  ;;  %s2106_s15 = int_to_ptr.vmem [resolvable:$true] %s344_s15 }
  0x16   : > { %s2493_s28 = scalar_select %p2091_p3, 1, 0 }
  0x17   : > { %p1612_p5 = pneg %p2091_p3 }
  0x19   : > { %p2100_p6 = pnand %p1612_p5, %p2483_p1 }
  0x1b   : > { %s1737_s18 = scalar_lea.hbm %s2495_s1, 1024  ;;  %p2116_p8 = pneg %p2100_p6 }
  0x1c   : > { %p1738_p7 = scmp.ne.s32.totalorder %s2495_s1, %s1737_s18  ;;  %p1744_p11 = scmp.lt.u32.totalorder %s1737_s18, %s2495_s1 }
  0x1e   : > { %p1740_p9 = pnand %p2116_p8, %p1738_p7 }
  0x20   : > { %p1741_p10 = pneg %p1740_p9 }
  0x22   : > { %p1746_p12 = pnand %p1744_p11, %p1741_p10 }
  0x24   : > { %1749 = shalt.err (!%p1746_p12)
}
  0x25   : > { %s1750_s16 = scalar_lea.vmem %s2089_s26, 1024  ;;  %p1758_p5 = scmp.lt.s32.totalorder %s2089_s26, %s2089_s26 }
  0x26   : > { %p1751_p13 = scmp.ne.s32.totalorder %s2089_s26, %s1750_s16  ;;  %p1759_p4 = scmp.lt.s32.totalorder %s1750_s16, %s1750_s16 }
  0x28   : > { %p1753_p0 = pnand %p1751_p13, %p2116_p8  ;;  %p1760_p7 = por %p1759_p4, %p1758_p5 }
  0x2a   : > { %p1754_p2 = pneg %p1753_p0 }
  0x2c   : > { %p1761_p9 = pnand %p1760_p7, %p1754_p2 }
  0x2e   : > { %1764 = shalt.err (!%p1761_p9)
}
  0x2f   : > { %s1990_s17 = smov 64   ;;  %s1991_s18 = smov 4  }
  0x30   : > { %1615 = dma.hbm_to_vmem [thread:$0]  (!%p2100_p6), %s2495_s1, 1024, %s2089_s26, [#allocation6], %s1990_s17, %s1990_s17, %s1991_s18  }
  0x31   : > { %s1765_s16 = scalar_lea.hbm %s2472_s3, 1024 }
  0x32   : > { %p1766_p4 = scmp.ne.s32.totalorder %s2472_s3, %s1765_s16  ;;  %p1772_p12 = scmp.lt.u32.totalorder %s1765_s16, %s2472_s3 }
  0x34   : > { %p1768_p10 = pnand %p1766_p4, %p2116_p8 }
  0x36   : > { %p1769_p11 = pneg %p1768_p10 }
  0x38   : > { %p1774_p13 = pnand %p1772_p12, %p1769_p11 }
  0x3a   : > { %1777 = shalt.err (!%p1774_p13)
}
  0x3b   : > { %s1778_s26 = scalar_lea.vmem %s2104_s30, 1024  ;;  %p1786_p7 = scmp.lt.s32.totalorder %s2104_s30, %s2104_s30 }
  0x3c   : > { %p1779_p0 = scmp.ne.s32.totalorder %s2104_s30, %s1778_s26  ;;  %p1787_p9 = scmp.lt.s32.totalorder %s1778_s26, %s1778_s26 }
  0x3e   : > { %p1781_p2 = pnand %p1779_p0, %p2116_p8  ;;  %p1788_p4 = por %p1787_p9, %p1786_p7 }
  0x40   : > { %p1782_p5 = pneg %p1781_p2 }
  0x42   : > { %p1789_p10 = pnand %p1788_p4, %p1782_p5 }
  0x44   : > { %1792 = shalt.err (!%p1789_p10)
}
  0x45   : > { %1621 = dma.hbm_to_vmem [thread:$0]  (!%p2100_p6), %s2472_s3, 1024, %s2104_s30, [#allocation9], %s1990_s17, %s1990_s17, %s1991_s18  }
  0x46   : > { %s2497_s2 = sld [smem:[#allocation21_spill]] }
  0x4c   : > { %s1793_s19 = scalar_lea.hbm %s2497_s2, 1024 }
  0x4d   : > { %p1794_p11 = scmp.ne.s32.totalorder %s2497_s2, %s1793_s19  ;;  %p1800_p0 = scmp.lt.u32.totalorder %s1793_s19, %s2497_s2 }
  0x4f   : > { %p1796_p12 = pnand %p1794_p11, %p2116_p8 }
  0x51   : > { %p1797_p13 = pneg %p1796_p12 }
  0x53   : > { %p1802_p2 = pnand %p1800_p0, %p1797_p13 }
  0x55   : > { %1805 = shalt.err (!%p1802_p2)
}
  0x56   : > { %s1806_s30 = scalar_lea.vmem %s2106_s15, 1024  ;;  %p1814_p4 = scmp.lt.s32.totalorder %s2106_s15, %s2106_s15 }
  0x57   : > { %p1807_p5 = scmp.ne.s32.totalorder %s2106_s15, %s1806_s30  ;;  %p1815_p10 = scmp.lt.s32.totalorder %s1806_s30, %s1806_s30 }
  0x59   : > { %p1809_p7 = pnand %p1807_p5, %p2116_p8  ;;  %p1816_p11 = por %p1815_p10, %p1814_p4 }
  0x5b   : > { %p1810_p9 = pneg %p1809_p7 }
  0x5d   : > { %p1817_p12 = pnand %p1816_p11, %p1810_p9 }
  0x5f   : > { %1820 = shalt.err (!%p1817_p12)
}
  0x60   : > { %1618 = dma.hbm_to_vmem [thread:$0]  (!%p2100_p6), %s2497_s2, 1024, %s2106_s15, [#allocation6], %s1990_s17, %s1990_s17, %s1991_s18  }
  0x61   : > { %s1992_s10 = smov [#allocation10]   ;;  %s1993_s12 = smov [#allocation11]  }
  0x62   : > { %s370_s11 = sshll.u32 %s1992_s10, 4  ;;  %s386_s19 = sshll.u32 %s1993_s12, 4  ;;  %s371_s11 = int_to_ptr.vmem [resolvable:$true] %s370_s11  ;;  %s387_s19 = int_to_ptr.vmem [resolvable:$true] %s386_s19 }
  0x63   : > { %s1821_s14 = scalar_lea.hbm %s2473_s4, 1024 }
  0x64   : > { %p1822_p13 = scmp.ne.s32.totalorder %s2473_s4, %s1821_s14  ;;  %p1828_p5 = scmp.lt.u32.totalorder %s1821_s14, %s2473_s4 }
  0x66   : > { %p1824_p0 = pnand %p1822_p13, %p2116_p8 }
  0x68   : > { %p1825_p2 = pneg %p1824_p0 }
  0x6a   : > { %p1830_p7 = pnand %p1828_p5, %p1825_p2 }
  0x6c   : > { %1833 = shalt.err (!%p1830_p7)
}
  0x6d   : > { %s1834_s15 = scalar_lea.vmem %s371_s11, 1024  ;;  %p1842_p11 = scmp.lt.s32.totalorder %s371_s11, %s371_s11 }
  0x6e   : > { %p1835_p9 = scmp.ne.s32.totalorder %s371_s11, %s1834_s15  ;;  %p1843_p12 = scmp.lt.s32.totalorder %s1834_s15, %s1834_s15 }
  0x70   : > { %p1837_p4 = pnand %p1835_p9, %p2116_p8  ;;  %p1844_p1 = por %p1843_p12, %p1842_p11 }
  0x72   : > { %p1838_p10 = pneg %p1837_p4 }
  0x74   : > { %p1845_p3 = pnand %p1844_p1, %p1838_p10 }
  0x76   : > { %1848 = shalt.err (!%p1845_p3)
}
  0x77   : > { %1624 = dma.hbm_to_vmem [thread:$0]  (!%p2100_p6), %s2473_s4, 1024, %s371_s11, [#allocation9], %s1990_s17, %s1990_s17, %s1991_s18  }
  0x78   : > { %s1849_s20 = scalar_lea.hbm %s2475_s6, 1024 }
  0x79   : > { %p1850_p1 = scmp.ne.s32.totalorder %s2475_s6, %s1849_s20  ;;  %p1856_p0 = scmp.lt.u32.totalorder %s1849_s20, %s2475_s6 }
  0x7b   : > { %p1852_p3 = pnand %p1850_p1, %p2116_p8 }
  0x7d   : > { %p1853_p13 = pneg %p1852_p3 }
  0x7f   : > { %p1858_p2 = pnand %p1856_p0, %p1853_p13 }
  0x81   : > { %1861 = shalt.err (!%p1858_p2)
}
  0x82   : > { %s1862_s26 = scalar_lea.vmem %s387_s19, 1024  ;;  %p1870_p4 = scmp.lt.s32.totalorder %s387_s19, %s387_s19 }
  0x83   : > { %p1863_p5 = scmp.ne.s32.totalorder %s387_s19, %s1862_s26  ;;  %p1871_p10 = scmp.lt.s32.totalorder %s1862_s26, %s1862_s26 }
  0x85   : > { %p1865_p7 = pnand %p1863_p5, %p2116_p8  ;;  %p1872_p11 = por %p1871_p10, %p1870_p4 }
  0x87   : > { %p1866_p9 = pneg %p1865_p7 }
  0x89   : > { %p1873_p12 = pnand %p1872_p11, %p1866_p9 }
  0x8b   : > { %1876 = shalt.err (!%p1873_p12)
}
  0x8c   : > { %1627 = dma.hbm_to_vmem [thread:$0]  (!%p2100_p6), %s2475_s6, 1024, %s387_s19, [#allocation12], %s1990_s17, %s1990_s17, %s1991_s18  }
  0x8d   : > { %s1350_s13 = sadd.s32 4294967294, %s1985_s24   ;;  %s2236_s25 = sadd.s32 1, %s1985_s24  }
  0x8e   : > { %s38_s1 = sadd.s32 1, %s1981_s23  ;;  %s35_s7 = ssub.s32 %s1985_s24, %s2236_s25 }
  0x8f   : > { %p45_p8 = scmp.ne.s32.totalorder %s1981_s23, %s1977_s22  ;;  %p36_p1 = scmp.eq.s32.totalorder %s35_s7, 0 }
  0x90   : > { %p46_p3 = scmp.eq.s32.totalorder %s1985_s24, 0  ;;  %p51_p13 = scmp.ne.s32.totalorder %s1977_s22, %s1973_s21 }
  0x91   : > { %p306_p0 = scmp.eq.s32.totalorder %s2084_s27, 1  ;;  %p2498_p5 = scmp.eq.s32.totalorder %s2084_s27, 0 }
  0x92   : > { %s2248_s10 = scalar_select %p36_p1, %s1981_s23, %s38_s1  }
  0x93   : > { %p47_p2 = por %p46_p3, %p45_p8  ;;  %p2252_p7 = por %p2498_p5, %p51_p13 }
  0x94   : > { %p2256_p6 = por %p306_p0, %p45_p8  ;;  %p312_p9 = scmp.eq.s32.totalorder %s1350_s13, 1 }
  0x95   : > { %p1641_p4 = scmp.lt.s32.totalorder %s1985_s24, 2  ;;  %s415_s18 = sand.u32 1, %s1981_s23  }
  0x96   : > { %s2500_s17 = scalar_select %p2256_p6, 1, 0 }
  0x97   : > { %p2262_p10 = por %p312_p9, %p51_p13  ;;  %s1358_s20 = sshll.u32 %s415_s18, 3 }
  0x98   : > { %s1359_s29 = sshll.u32 %s1985_s24, 7  ;;  %s2502_s0 = sld [smem:[#allocation19_spill]] }
  0x99   : > { %s2501_s19 = scalar_select %p2262_p10, 1, 0 }
  0x9a   : > { %s419_s26 = scalar_lea.vmem [#allocation2], %s1358_s20  ;;  %p2272_p11 = pnand %p1641_p4, %p47_p2 }
  0x9b   : > { %s426_s11 = sshll.u32 %s419_s26, 4  ;;  %s416_s13 = scalar_lea.sflag [#allocation3], %s415_s18  ;;  %s2276_s11 = int_to_ptr.vmem [resolvable:$true] %s426_s11 }
  0x9c   : > { %p1879_p8 = pneg %p2272_p11 }
  0x9e   : > { %s2270_s30 = scalar_lea.hbm %s2502_s0, %s1359_s29  ;;  %s1882_s29 = scalar_lea.hbm %s2502_s0, 256 }
  0x9f   : > { %s1877_s1 = scalar_lea.hbm %s2270_s30, 128  ;;  %p1883_p13 = scmp.lt.u32.totalorder %s2270_s30, %s2502_s0 }
  0xa0   : > { %p1878_p12 = scmp.ne.s32.totalorder %s2270_s30, %s1877_s1  ;;  %p1884_p0 = scmp.lt.u32.totalorder %s1882_s29, %s1877_s1 }
  0xa1   : > { %p1886_p5 = scmp.lt.u32.totalorder %s1877_s1, %s2270_s30 }
  0xa2   : > { %p1880_p1 = pnand %p1879_p8, %p1878_p12  ;;  %p1885_p2 = por %p1884_p0, %p1883_p13 }
  0xa4   : > { %p1881_p3 = pneg %p1880_p1  ;;  %p1887_p9 = por %p1886_p5, %p1885_p2 }
  0xa6   : > { %p1888_p4 = pnand %p1887_p9, %p1881_p3 }
  0xa8   : > { %1891 = shalt.err (!%p1888_p4)
}
  0xa9   : > { %s1892_s18 = scalar_lea.vmem %s2276_s11, 128  ;;  %s1994_s26 = smov [#allocation2]  }
  0xaa   : > { %p1893_p12 = scmp.ne.s32.totalorder %s2276_s11, %s1892_s18  ;;  %s1897_s7 = sshll.u32 %s1994_s26, 4  ;;  %s1898_s7 = int_to_ptr.vmem [resolvable:$false] %s1897_s7 }
  0xab   : > { %s1899_s20 = scalar_lea.vmem %s1898_s7, 256  ;;  %p1900_p6 = scmp.lt.s32.totalorder %s2276_s11, %s1898_s7 }
  0xac   : > { %p1895_p1 = pnand %p1893_p12, %p1879_p8  ;;  %p1901_p13 = scmp.lt.s32.totalorder %s1899_s20, %s1892_s18 }
  0xae   : > { %p1896_p10 = pneg %p1895_p1  ;;  %p1902_p0 = por %p1901_p13, %p1900_p6 }
  0xb0   : > { %p1903_p2 = pnand %p1902_p0, %p1896_p10 }
  0xb2   : > { %1906 = shalt.err (!%p1903_p2)
}
  0xb3   : > { %1631 = dma.hbm_to_vmem [thread:$0]  (!%p2272_p11), %s2270_s30, 128, %s2276_s11, %s416_s13  }
  0xb4   : > { %p2504_p3 = scmp.ne.s32.totalorder %s2493_s28, 0 }
  0xb5   : > { %s2306_s1 = sand.u32 (!%p2504_p3), 1, %s1977_s22  }
  0xb6   : > { %435 = sbr.rel (%p2504_p3) target bundleno = 2209 (0x8a1), region = 68  ;;  %s1361_s29 = sshll.u32 (!%p2504_p3), %s2306_s1, 3 }
  0xb7   : > { %s438_s14 = scalar_lea.sflag (!%p2504_p3), [#allocation3], %s2306_s1  ;;  %s2312_s16 = scalar_lea.vmem (!%p2504_p3), [#allocation2], %s1361_s29 }
  0xbd   : > { %1952 = dma.done.wait (%p2252_p7), %s438_s14, 128  }
  0xbe   : > { %1954 = vsyncadd (%p2252_p7), %s438_s14, 4294967168  ;;  %p2505_p6 = scmp.eq.s32.totalorder %s2084_s27, 0 }
  0xc0   : > { %1956 = dma.done.wait (%p2505_p6), [#allocation6], 2048   ;;  %p2506_p10 = pmov %p2505_p6 }
  0xc1   : > { %p2507_p11 = pmov %p2505_p6 }
  0xc2   : > { %1958 = vsyncadd (%p2506_p10), [#allocation6], 4294965248 }
  0xc3   : > { %1960 = dma.done.wait (%p2507_p11), [#allocation9], 2048   ;;  %p2508_p8 = pmov %p2505_p6 }
  0xc4   : > { %p2509_p5 = pmov %p2505_p6 }
  0xc5   : > { %1962 = vsyncadd (%p2508_p8), [#allocation9], 4294965248 }
  0xc6   : > { %1964 = dma.done.wait (%p2509_p5), [#allocation12], 1024   ;;  %p2510_p9 = pmov %p2509_p5 }
  0xc7   : > { %v1995_v0 = vmov 0.0   ;;  %vm1996_vm0 = vmmov 0   ;;  %v1689_v1 = vld [vmem:[#allocation7] sm:$0xff]   ;;  %v1691_v3 = vld [vmem:[#allocation7 + $0x8] sm:$0xff]   ;;  %v1693_v5 = vld [vmem:[#allocation7 + $0x10] sm:$0xff]   ;;  %vm860_vm1 = vcmask 64512  }
  0xc8   : > { %1966 = vsyncadd (%p2510_p9), [#allocation12], 4294966272  ;;  %1484 = vmatprep.subr.bf16.mxu1 %v1995_v0  ;;  %1464 = vmatprep.subr.bf16.mxu0 %v1995_v0  ;;  %v1690_v2 = vld [vmem:[#allocation5] sm:$0xff]   ;;  %v1692_v4 = vld [vmem:[#allocation5 + $0x8] sm:$0xff]   ;;  %vm877_vm2 = vcmask 1043456   ;;  %s2514_s0 = sld [smem:[#allocation25_spill]] }
  0xc9   : > { %1500 = vmatprep.mubr.msk.bf16.mxu1 %vm1996_vm0, %v1995_v0  ;;  %1480 = vmatprep.mubr.msk.bf16.mxu0 %vm1996_vm0, %v1995_v0  ;;  %v1694_v6 = vld [vmem:[#allocation5 + $0x10] sm:$0xff]   ;;  %v1695_v7 = vld [vmem:[#allocation7 + $0x18] sm:$0xff]   ;;  %v1697_v9 = vld [vmem:[#allocation7 + $0x20] sm:$0xff]   ;;  %p2515_p4 = scmp.ne.s32.totalorder %s2500_s17, 0 }
  0xca   : > { %1485 = vmatpush3.bf16.msra.mxu1 %v1689_v1  ;;  %1465 = vmatpush3.bf16.msra.mxu0 %v1690_v2  ;;  %v1696_v8 = vld [vmem:[#allocation5 + $0x18] sm:$0xff]   ;;  %v1698_v10 = vld [vmem:[#allocation5 + $0x20] sm:$0xff]   ;;  %v1699_v11 = vld [vmem:[#allocation7 + $0x28] sm:$0xff]  }
  0xcb   : > { %1486 = vmatprep.subr.bf16.mxu1 %v1995_v0  ;;  %1466 = vmatprep.subr.bf16.mxu0 %v1995_v0  ;;  %v1700_v12 = vld [vmem:[#allocation5 + $0x28] sm:$0xff]   ;;  %v1701_v13 = vld [vmem:[#allocation7 + $0x30] sm:$0xff]   ;;  %v1703_v15 = vld [vmem:[#allocation7 + $0x38] sm:$0xff]  }
  0xcc   : > { %v1702_v14 = vld [vmem:[#allocation5 + $0x30] sm:$0xff]   ;;  %v1704_v17 = vld [vmem:[#allocation5 + $0x38] sm:$0xff]   ;;  %v1705_v30 = vld [vmem:[#allocation8] sm:$0xff]  }
  0xcd   : > { %v2349_v16 = vld [vmem:[%s2312_s16] sm:$0xff]  ;;  %v1706_v31 = vld [vmem:[#allocation8 + $0x8] sm:$0xff]   ;;  %v1709_v34 = vld [vmem:[#allocation8 + $0x20] sm:$0xff]  }
  0xce   : > { %1487 = vmatpush3.bf16.msra.mxu1 %v1691_v3  ;;  %1467 = vmatpush3.bf16.msra.mxu0 %v1692_v4  ;;  %v504_v18 = vpack.c.bf16 %v2349_v16, %v2349_v16  ;;  %v1707_v32 = vld [vmem:[#allocation8 + $0x10] sm:$0xff]   ;;  %v1708_v33 = vld [vmem:[#allocation8 + $0x18] sm:$0xff]   ;;  %v1710_v35 = vld [vmem:[#allocation8 + $0x28] sm:$0xff]  }
  0xcf   : > { %1488 = vmatprep.subr.bf16.mxu1 %v1995_v0  ;;  %1468 = vmatprep.subr.bf16.mxu0 %v1995_v0  ;;  %v1711_v36 = vld [vmem:[#allocation8 + $0x30] sm:$0xff]   ;;  %v1712_v37 = vld [vmem:[#allocation8 + $0x38] sm:$0xff]   ;;  %v1713_v1 = vld [vmem:[#allocation10] sm:$0xff]  }
  0xd0   : > { %v1714_v2 = vld [vmem:[#allocation10 + $0x8] sm:$0xff]   ;;  %v1715_v3 = vld [vmem:[#allocation10 + $0x10] sm:$0xff]   ;;  %v1716_v4 = vld [vmem:[#allocation10 + $0x18] sm:$0xff]  }
  0xd2   : > { %1489 = vmatpush3.bf16.msra.mxu1 %v1693_v5  ;;  %1469 = vmatpush3.bf16.msra.mxu0 %v1694_v6  ;;  %v1717_v5 = vld [vmem:[#allocation10 + $0x20] sm:$0xff]   ;;  %v1718_v6 = vld [vmem:[#allocation10 + $0x28] sm:$0xff]  }
  0xd3   : > { %1490 = vmatprep.subr.bf16.mxu1 %v1995_v0  ;;  %1470 = vmatprep.subr.bf16.mxu0 %v1995_v0 }
  0xd6   : > { %1491 = vmatpush3.bf16.msra.mxu1 %v1695_v7  ;;  %1471 = vmatpush3.bf16.msra.mxu0 %v1696_v8 }
  0xd7   : > { %1492 = vmatprep.subr.bf16.mxu1 %v1995_v0  ;;  %1472 = vmatprep.subr.bf16.mxu0 %v1995_v0 }
  0xda   : > { %1493 = vmatpush3.bf16.msra.mxu1 %v1697_v9  ;;  %1473 = vmatpush3.bf16.msra.mxu0 %v1698_v10 }
  0xdb   : > { %1494 = vmatprep.subr.bf16.mxu1 %v1995_v0  ;;  %1474 = vmatprep.subr.bf16.mxu0 %v1995_v0 }
  0xde   : > { %1495 = vmatpush3.bf16.msra.mxu1 %v1699_v11  ;;  %1475 = vmatpush3.bf16.msra.mxu0 %v1700_v12 }
  0xdf   : > { %1496 = vmatprep.subr.bf16.mxu1 %v1995_v0  ;;  %1476 = vmatprep.subr.bf16.mxu0 %v1995_v0 }
  0xe2   : > { %1497 = vmatpush3.bf16.msra.mxu1 %v1701_v13  ;;  %1477 = vmatpush3.bf16.msra.mxu0 %v1702_v14 }
  0xe3   : > { %1498 = vmatprep.subr.bf16.mxu1 %v1995_v0  ;;  %1478 = vmatprep.subr.bf16.mxu0 %v1995_v0 }
  0xe6   : > { %1499 = vmatpush3.bf16.msra.mxu1 %v1703_v15  ;;  %1479 = vmatpush3.bf16.msra.mxu0 %v1704_v17  ;;  %v1719_v15 = vld [vmem:[#allocation10 + $0x30] sm:$0xff]  }
  0xe7   : > { %1524 = vmatprep.subr.bf16.mxu1 %v1995_v0  ;;  %1504 = vmatprep.subr.bf16.mxu0 %v1995_v0 }
  0xe9   : > { %1501 = vmatmul.mubr.bf16.vlgmr.msra.gmra.mrb[0].mxu1 %v504_v18  ;;  %1481 = vmatmul.mubr.bf16.vlgmr.msra.gmra.mrb[0].mxu0 %v504_v18 }
  0xea   : > { %1526 = vmatprep.mubr.msk.bf16.mxu1 %vm1996_vm0, %v1995_v0  ;;  %1520 = vmatprep.mubr.msk.bf16.mxu0 %vm1996_vm0, %v1995_v0 }
  0xeb   : > { %1505 = vmatpush3.bf16.msra.mxu0 %v1705_v30 }
  0xec   : > { %1506 = vmatprep.subr.bf16.mxu0 %v1995_v0 }
  0xef   : > { %1507 = vmatpush3.bf16.msra.mxu0 %v1706_v31 }
  0xf0   : > { %1508 = vmatprep.subr.bf16.mxu0 %v1995_v0 }
  0xf3   : > { %1509 = vmatpush3.bf16.msra.mxu0 %v1707_v32 }
  0xf4   : > { %1510 = vmatprep.subr.bf16.mxu0 %v1995_v0 }
  0xf7   : > { %1511 = vmatpush3.bf16.msra.mxu0 %v1708_v33 }
  0xf8   : > { %1512 = vmatprep.subr.bf16.mxu0 %v1995_v0 }
  0xfb   : > { %1513 = vmatpush3.bf16.msra.mxu0 %v1709_v34  ;;  %v945_v34 = vld [vmem:[%s2477_s8] sm:$0xff] }
  0xfc   : > { %1514 = vmatprep.subr.bf16.mxu0 %v1995_v0 }
  0xff   : > { %1515 = vmatpush3.bf16.msra.mxu0 %v1710_v35 }
 0x100   : > { %1516 = vmatprep.subr.bf16.mxu0 %v1995_v0 }
 0x103   : > { %1517 = vmatpush3.bf16.msra.mxu0 %v1711_v36  ;;  %v955_v36 = vld [vmem:[%s2478_s9] sm:$0xff] }
 0x104   : > { %1518 = vmatprep.subr.bf16.mxu0 %v1995_v0 }
 0x107   : > { %1519 = vmatpush3.bf16.msra.mxu0 %v1712_v37 }
 0x108   : > { %1556 = vmatprep.subr.bf16.mxu0 %v1995_v0 }
 0x10a   : > { %1521 = vmatmul.mubr.bf16.vlgmr.msra.gmra.mrb[4].mxu0 %v504_v18 }
 0x10b   : > { %1572 = vmatprep.mubr.msk.bf16.mxu0 %vm1996_vm0, %v1995_v0 }
 0x1bc   : > { %v707_v19 = vpop.f32.mrb[0].mxu1  ;;  %v603_v22 = vpop.f32.mrb[0].mxu0 }
 0x1bd   : > { %v819_v20 = vpack.c.bf16 %v707_v19, %v707_v19  ;;  %v1502_v21 = vpop.f32.mrb[1].mxu1  ;;  %v817_v24 = vmul.f32 0.17677669, %v603_v22  ;;  %v1482_v25 = vpop.f32.mrb[1].mxu0 }
 0x1be   : > { %v710_v23 = vpop.f32.mrb[2].mxu1  ;;  %v606_v27 = vpop.f32.mrb[2].mxu0  ;;  %v1723_v25 = vld [vmem:[#allocation11 + $0x10] sm:$0xff]  }
 0x1bf   : > { %v1503_v26 = vpop.f32.mrb[3].mxu1  ;;  %1525 = vmatpush3.bf16.xpose.msra.mxu1 %v819_v20  ;;  %v1483_v28 = vpop.f32.mrb[3].mxu0  ;;  %v818_v29 = vpack.c.bf16 %v817_v24, %v817_v24  ;;  %v1720_v20 = vld [vmem:[#allocation10 + $0x38] sm:$0xff]   ;;  %v1721_v23 = vld [vmem:[#allocation11] sm:$0xff]   ;;  %v1722_v24 = vld [vmem:[#allocation11 + $0x8] sm:$0xff]  }
 0x1c0   : > { %1530 = vmatprep.subr.bf16.mxu1 %v1995_v0  ;;  %1557 = vmatpush3.bf16.msra.mxu0 %v1721_v23  ;;  %v1724_v26 = vld [vmem:[#allocation11 + $0x18] sm:$0xff]   ;;  %v1725_v27 = vld [vmem:[#allocation11 + $0x20] sm:$0xff]   ;;  %v1726_v28 = vld [vmem:[#allocation11 + $0x28] sm:$0xff]  }
 0x1c1   : > { %1558 = vmatprep.subr.bf16.mxu0 %v1995_v0 }
 0x1c4   : > { %1559 = vmatpush3.bf16.msra.mxu0 %v1722_v24 }
 0x1c5   : > { %1560 = vmatprep.subr.bf16.mxu0 %v1995_v0 }
 0x1c6   : > { %1527 = vmatmul.mubr.bf16.vlgmr.msra.gmra.mrb[4].mxu1 %v818_v29  ;;  %v1727_v29 = vld [vmem:[#allocation11 + $0x30] sm:$0xff]  }
 0x1c7   : > { %1532 = vmatprep.mubr.msk.bf16.mxu1 %vm1996_vm0, %v1995_v0 }
 0x1c8   : > { %1561 = vmatpush3.bf16.msra.mxu0 %v1723_v25 }
 0x1c9   : > { %1562 = vmatprep.subr.bf16.mxu0 %v1995_v0 }
 0x1cc   : > { %1563 = vmatpush3.bf16.msra.mxu0 %v1724_v26 }
 0x1cd   : > { %1564 = vmatprep.subr.bf16.mxu0 %v1995_v0 }
 0x1d0   : > { %1565 = vmatpush3.bf16.msra.mxu0 %v1725_v27 }
 0x1d1   : > { %1566 = vmatprep.subr.bf16.mxu0 %v1995_v0 }
 0x1d4   : > { %1567 = vmatpush3.bf16.msra.mxu0 %v1726_v28 }
 0x1d5   : > { %1568 = vmatprep.subr.bf16.mxu0 %v1995_v0 }
 0x1d8   : > { %1569 = vmatpush3.bf16.msra.mxu0 %v1727_v29 }
 0x1d9   : > { %1570 = vmatprep.subr.bf16.mxu0 %v1995_v0 }
 0x1dd   : > { %v811_v48 = vpop.f32.mrb[4].mxu0 }
 0x1de   : > { %v1522_v49 = vpop.f32.mrb[5].mxu0  ;;  %v873_v52 = vpack.c.bf16 %v811_v48, %v811_v48 }
 0x1df   : > { %v814_v50 = vpop.f32.mrb[6].mxu0 }
 0x1e0   : > { %v1523_v51 = vpop.f32.mrb[7].mxu0  ;;  %v879_v53 = vsel %vm877_vm2, %v873_v52, 0 }
 0x1e1   : > { %1531 = vmatpush3.bf16.msra.mxu1 %v879_v53 }
 0x1e2   : > { %1536 = vmatprep.subr.bf16.mxu1 %v1995_v0 }
 0x299   : > { %v854_v38 = vpop.f32.mrb[4].mxu1 }
 0x29a   : > { %v1528_v39 = vpop.f32.mrb[5].mxu1  ;;  %v861_v40 = vsel %vm860_vm1, %v854_v38, -inf }
 0x29b   : > { %862 = vmax.xlane.f32.xlu0 %v861_v40  ;;  %v857_v41 = vpop.f32.mrb[6].mxu1  ;;  %v1728_v40 = vld [vmem:[#allocation11 + $0x38] sm:$0xff]  }
 0x29c   : > { %v1529_v42 = vpop.f32.mrb[7].mxu1  ;;  %1571 = vmatpush3.bf16.msra.mxu0 %v1728_v40  ;;  %v1393_v41 = vld [vmem:[%s2474_s5] ss:$0 sm:$0xff] }
 0x328   : > { %v863_v43 = vpop.xlane.xlu0 %862 }
 0x329   : > { %v864_v44 = vsub.f32 %v854_v38, %v863_v43 }
 0x32b   : > { %v865_v45 = vmul.f32 1.442695, %v864_v44 }
 0x32d   : > { %1729 = vpow2.f32 %v865_v45 }
 0x337   : > { %v1730_v46 = vpop.eup %1729 }
 0x338   : > { %v867_v47 = vsel %vm860_vm1, %v1730_v46, 0.0 }
 0x339   : > { %868 = vadd.xlane.f32.xlu0 %v867_v47 }
 0x3c6   : > { %v869_v54 = vpop.xlane.xlu0 %868 }
 0x3c7   : > { %1731 = vrcp.f32 %v869_v54 }
 0x3d1   : > { %v1732_v55 = vpop.eup %1731 }
 0x3d2   : > { %v871_v56 = vmul.f32 %v1732_v55, %v1730_v46 }
 0x3d4   : > { %v872_v57 = vpack.c.bf16 %v871_v56, %v871_v56 }
 0x3d6   : > { %1533 = vmatmul.mubr.msk.bf16.vlgmr.msra.gmra.mrb[8].mxu1 %vm860_vm1, %v872_v57 }
 0x3d7   : > { %1552 = vmatprep.mubr.msk.bf16.mxu1 %vm1996_vm0, %v1995_v0  ;;  %1537 = vmatpush3.bf16.msra.mxu1 %v1713_v1 }
 0x3d8   : > { %1538 = vmatprep.subr.bf16.mxu1 %v1995_v0 }
 0x3db   : > { %1539 = vmatpush3.bf16.msra.mxu1 %v1714_v2 }
 0x3dc   : > { %1540 = vmatprep.subr.bf16.mxu1 %v1995_v0 }
 0x3df   : > { %1541 = vmatpush3.bf16.msra.mxu1 %v1715_v3 }
 0x3e0   : > { %1542 = vmatprep.subr.bf16.mxu1 %v1995_v0 }
 0x3e3   : > { %1543 = vmatpush3.bf16.msra.mxu1 %v1716_v4 }
 0x3e4   : > { %1544 = vmatprep.subr.bf16.mxu1 %v1995_v0 }
 0x3e7   : > { %1545 = vmatpush3.bf16.msra.mxu1 %v1717_v5 }
 0x3e8   : > { %1546 = vmatprep.subr.bf16.mxu1 %v1995_v0 }
 0x3eb   : > { %1547 = vmatpush3.bf16.msra.mxu1 %v1718_v6 }
 0x3ec   : > { %1548 = vmatprep.subr.bf16.mxu1 %v1995_v0 }
 0x3ef   : > { %1549 = vmatpush3.bf16.msra.mxu1 %v1719_v15 }
 0x3f0   : > { %1550 = vmatprep.subr.bf16.mxu1 %v1995_v0 }
 0x3f3   : > { %1551 = vmatpush3.bf16.msra.mxu1 %v1720_v20 }
 0x4a9   : > { %v915_v58 = vpop.f32.mrb[8].mxu1 }
 0x4aa   : > { %v2381_v59 = vadd.f32 %v915_v58, %v2349_v16  ;;  %v1534_v60 = vpop.f32.mrb[9].mxu1 }
 0x4ab   : > { %v918_v61 = vpop.f32.mrb[10].mxu1 }
 0x4ac   : > { %922 = vadd.xlane.f32.xlu1 %v2381_v59  ;;  %v1535_v62 = vpop.f32.mrb[11].mxu1  ;;  %v932_v63 = vmul.f32 %v2381_v59, %v2381_v59 }
 0x4b0   : > { %933 = vadd.xlane.f32.xlu1 %v932_v63 }
 0x539   : > { %v923_v7 = vpop.xlane.xlu1 %922 }
 0x53a   : > { %v924_v8 = vrot.slane %v923_v7, 4 }
 0x53c   : > { %v925_v9 = vadd.f32 %v924_v8, %v923_v7 }
 0x53d   : > { %v934_v10 = vpop.xlane.xlu1 %933 }
 0x53e   : > { %v926_v11 = vrot.slane %v925_v9, 2  ;;  %v935_v12 = vrot.slane %v934_v10, 4 }
 0x540   : > { %v936_v13 = vadd.f32 %v935_v12, %v934_v10  ;;  %v927_v14 = vadd.f32 %v926_v11, %v925_v9 }
 0x542   : > { %v937_v16 = vrot.slane %v936_v13, 2  ;;  %v928_v17 = vrot.slane %v927_v14, 1 }
 0x544   : > { %v929_v18 = vadd.f32 %v928_v17, %v927_v14  ;;  %v938_v19 = vadd.f32 %v937_v16, %v936_v13 }
 0x546   : > { %1576 = vpush %v929_v18  ;;  %v939_v21 = vrot.slane %v938_v19, 1 }
 0x548   : > { %v940_v22 = vadd.f32 %v939_v21, %v938_v19 }
 0x54a   : > { %1578 = vpush %v940_v22 }
 0x577   : > { %s1577_s28 = spop %1576 }
 0x578   : > { %s931_s12 = smul.f32 0.00390625, %s1577_s28 }
 0x57a   : > { %s943_s30 = smul.f32 %s931_s12, %s931_s12  ;;  %v946_v32 = vstv %s931_s12 }
 0x57b   : > { %s1579_s11 = spop %1578  ;;  %v947_v33 = vsub.f32 %v2381_v59, %v946_v32 }
 0x57c   : > { %s942_s15 = smul.f32 0.00390625, %s1579_s11  ;;  %s2512_s11 = sld [smem:[#allocation23_spill]] }
 0x57e   : > { %s944_s13 = ssub.f32 %s942_s15, %s943_s30  ;;  %s2511_s15 = sld [smem:[#allocation22_spill]] }
 0x580   : > { %s948_s18 = sadd.f32 1e-05, %s944_s13 }
 0x582   : > { %v949_v30 = vstv %s948_s18  ;;  %v1205_v11 = vld [vmem:[%s2512_s11] sm:$0xff] }
 0x583   : > { %1733 = vrsqrt.f32 %v949_v30 }
 0x584   : > { %v1402_v48 = vld [vmem:[%s2511_s15] ss:$0 sm:$0xff] }
 0x58d   : > { %v1734_v31 = vpop.eup %1733 }
 0x58e   : > { %1580 = vpush %v1734_v31 }
 0x5bf   : > { %s1581_s26 = spop %1580 }
 0x5c0   : > { %v952_v0 = vstv %s1581_s26 }
 0x5c1   : > { %v953_v35 = vmul.f32 %v952_v0, %v947_v33 }
 0x5c3   : > { %v954_v37 = vmul.f32 %v953_v35, %v945_v34 }
 0x5c5   : > { %v956_v38 = vadd.f32 %v955_v36, %v954_v37 }
 0x5c7   : > { %v957_v39 = vpack.c.bf16 %v956_v38, %v956_v38 }
 0x5c9   : > { %1553 = vmatmul.mubr.bf16.vlgmr.msra.gmra.mrb[12].mxu1 %v957_v39 }
 0x69c   : > { %v1063_v42 = vpop.f32.mrb[12].mxu1 }
 0x69d   : > { %v1064_v43 = vadd.f32 %v1393_v41, %v1063_v42  ;;  %v1554_v44 = vpop.f32.mrb[13].mxu1 }
 0x69e   : > { %v1066_v45 = vpop.f32.mrb[14].mxu1 }
 0x69f   : > { %v1069_v46 = vpack.c.bf16 %v1064_v43, %v1064_v43  ;;  %v1555_v47 = vpop.f32.mrb[15].mxu1 }
 0x6a1   : > { %1573 = vmatmul.mubr.bf16.vlgmr.msra.gmra.mrb[8].mxu0 %v1069_v46 }
 0x774   : > { %v1175_v49 = vpop.f32.mrb[8].mxu0 }
 0x775   : > { %v1176_v50 = vadd.f32 %v1402_v48, %v1175_v49  ;;  %v1574_v51 = vpop.f32.mrb[9].mxu0 }
 0x776   : > { %v1178_v52 = vpop.f32.mrb[10].mxu0 }
 0x777   : > { %v1181_v53 = vadd.f32 %v1176_v50, %v956_v38  ;;  %v1575_v54 = vpop.f32.mrb[11].mxu0 }
 0x779   : > { %1182 = vadd.xlane.f32.xlu0 %v1181_v53  ;;  %v1192_v55 = vmul.f32 %v1181_v53, %v1181_v53 }
 0x77b   : > { %1193 = vadd.xlane.f32.xlu1 %v1192_v55 }
 0x806   : > { %v1183_v56 = vpop.xlane.xlu0 %1182 }
 0x807   : > { %v1184_v57 = vrot.slane %v1183_v56, 4 }
 0x808   : > { %v1194_v58 = vpop.xlane.xlu1 %1193 }
 0x809   : > { %v1185_v59 = vadd.f32 %v1184_v57, %v1183_v56  ;;  %v1195_v60 = vrot.slane %v1194_v58, 4 }
 0x80b   : > { %v1186_v61 = vrot.slane %v1185_v59, 2  ;;  %v1196_v62 = vadd.f32 %v1195_v60, %v1194_v58 }
 0x80d   : > { %v1187_v63 = vadd.f32 %v1186_v61, %v1185_v59  ;;  %v1197_v1 = vrot.slane %v1196_v62, 2 }
 0x80f   : > { %v1198_v2 = vadd.f32 %v1197_v1, %v1196_v62  ;;  %v1188_v3 = vrot.slane %v1187_v63, 1 }
 0x811   : > { %v1189_v4 = vadd.f32 %v1188_v3, %v1187_v63  ;;  %v1199_v5 = vrot.slane %v1198_v2, 1 }
 0x813   : > { %1582 = vpush %v1189_v4  ;;  %v1200_v6 = vadd.f32 %v1199_v5, %v1198_v2 }
 0x815   : > { %1584 = vpush %v1200_v6 }
 0x844   : > { %s1583_s13 = spop %1582 }
 0x845   : > { %s1191_s18 = smul.f32 0.00390625, %s1583_s13 }
 0x846   : > { %s1585_s26 = spop %1584 }
 0x847   : > { %s1203_s7 = smul.f32 %s1191_s18, %s1191_s18  ;;  %v1206_v9 = vstv %s1191_s18 }
 0x848   : > { %s1202_s20 = smul.f32 0.00390625, %s1585_s26  ;;  %v1207_v10 = vsub.f32 %v1181_v53, %v1206_v9  ;;  %s2513_s26 = sld [smem:[#allocation24_spill]] }
 0x84a   : > { %s1204_s14 = ssub.f32 %s1202_s20, %s1203_s7  ;;  %s1412_s7 = sshll.u32 %s2084_s27, 7 }
 0x84b   : > { %s501_s20 = scalar_lea.vmem [#allocation13], %s1361_s29  ;;  %s2425_s2 = scalar_lea.hbm %s2514_s0, %s1412_s7 }
 0x84c   : > { %s1208_s16 = sadd.f32 1e-05, %s1204_s14  ;;  %s1232_s14 = sshll.u32 %s501_s20, 4  ;;  %s2427_s14 = int_to_ptr.vmem [resolvable:$true] %s1232_s14 }
 0x84d   : > { %s1907_s12 = scalar_lea.vmem %s2427_s14, 128  ;;  %s1997_s27 = smov [#allocation13]  }
 0x84e   : > { %v1209_v7 = vstv %s1208_s16  ;;  %v1215_v14 = vld [vmem:[%s2513_s26] sm:$0xff]  ;;  %p1908_p7 = scmp.ne.s32.totalorder %s2427_s14, %s1907_s12  ;;  %s1911_s29 = sshll.u32 %s1997_s27, 4  ;;  %s1912_s29 = int_to_ptr.vmem [resolvable:$false] %s1911_s29 }
 0x84f   : > { %1735 = vrsqrt.f32 %v1209_v7  ;;  %s1913_s30 = scalar_lea.vmem %s1912_s29, 256  ;;  %p1914_p13 = scmp.lt.s32.totalorder %s2427_s14, %s1912_s29 }
 0x850   : > { %p1909_p12 = pnand %p1908_p7, %p2515_p4  ;;  %p1915_p0 = scmp.lt.s32.totalorder %s1913_s30, %s1907_s12 }
 0x852   : > { %p1910_p1 = pneg %p1909_p12  ;;  %p1916_p2 = por %p1915_p0, %p1914_p13 }
 0x854   : > { %p1917_p3 = pnand %p1916_p2, %p1910_p1 }
 0x859   : > { %v1736_v8 = vpop.eup %1735 }
 0x85a   : > { %1586 = vpush %v1736_v8 }
 0x88b   : > { %s1587_s28 = spop %1586 }
 0x88c   : > { %v1212_v12 = vstv %s1587_s28  ;;  %s1219_s28 = scalar_lea.sflag [#allocation4], %s2306_s1 }
 0x88d   : > { %v1213_v13 = vmul.f32 %v1212_v12, %v1207_v10 }
 0x88f   : > { %v1214_v15 = vmul.f32 %v1213_v13, %v1205_v11 }
 0x891   : > { %v1216_v16 = vadd.f32 %v1215_v14, %v1214_v15 }
 0x893   : > { %1217 = vst [vmem:[%s501_s20] sm:$0xff] %v1216_v16 }
 0x894   : > { %1920 = shalt.err (!%p1917_p3)
}
 0x895   : > { %s1921_s1 = scalar_lea.hbm %s2425_s2, 128  ;;  %s1925_s13 = scalar_lea.hbm %s2514_s0, 256 }
 0x896   : > { %p1922_p6 = scmp.ne.s32.totalorder %s2425_s2, %s1921_s1  ;;  %p1926_p8 = scmp.lt.u32.totalorder %s2425_s2, %s2514_s0 }
 0x897   : > { %p1927_p5 = scmp.lt.u32.totalorder %s1925_s13, %s1921_s1  ;;  %p1929_p7 = scmp.lt.u32.totalorder %s1921_s1, %s2425_s2 }
 0x898   : > { %p1923_p10 = pnand %p1922_p6, %p2515_p4 }
 0x899   : > { %p1928_p9 = por %p1927_p5, %p1926_p8 }
 0x89a   : > { %p1924_p11 = pneg %p1923_p10 }
 0x89b   : > { %p1930_p12 = por %p1929_p7, %p1928_p9 }
 0x89d   : > { %p1931_p1 = pnand %p1930_p12, %p1924_p11 }
 0x89f   : > { %1934 = shalt.err (!%p1931_p1)
}
 0x8a0   : > { %1610 = dma.vmem_to_hbm [thread:$0]  (%p2515_p4), %s2427_s14, 128, %s2425_s2, %s1219_s28  }
 0x8a1 PF: > { %s1244_s20 = sand.u32 1, %s1973_s21   ;;  %p2516_p13 = scmp.ne.s32.totalorder %s2501_s19, 0 }
 0x8a2   : > { %p2517_p0 = scmp.ge.s32.totalorder %s1985_s24, 2  ;;  %s1245_s18 = scalar_lea.sflag [#allocation4], %s1244_s20 }
 0x8a4   : > { %p1633_p2 = pnand %p2517_p0, %p2516_p13 }
 0x8a6   : > { %1968 = dma.done.wait (!%p1633_p2), %s1245_s18, 128  }
 0x8a7   : > { %1970 = vsyncadd (!%p1633_p2), %s1245_s18, 4294967168  ;;  %p28_p3 = scmp.ge.s32.totalorder %s2236_s25, 4   ;;  %s2518_s21 = smov %s1977_s22 }
 0x8a8   : > { %s2519_s22 = smov %s1981_s23  ;;  %s2520_s23 = smov %s2248_s10 }
 0x8a9   : > { %s2521_s24 = smov %s2236_s25  ;;  %30 = sbr.rel (!%p28_p3) target bundleno = 16 (0x10), region = 133 }
 0x8b0   :  { %1250 = vsyncpa [#allocation3], 1 }
 0x8b1   :  { %1252 = vsyncpa [#allocation3 + $0x1], 1 }
 0x8b2   :  { %1253 = vsyncpa [#allocation6], 1 }
 0x8b3   :  { %1254 = vsyncpa [#allocation9], 1 }
 0x8b4   :  { %1255 = vsyncpa [#allocation12], 1 }
 0x8b5   :  { %1256 = vsyncpa [#allocation4], 1 }
 0x8b6   :  { %1258 = vsyncpa [#allocation4 + $0x1], 1 }

</bundles_post_ra>
